<compile_context>
chip_gen: v7x
topology: tpu7x:2x2x1
jax: 0.10.0
libtpu: 0.0.40
codegen_flags: <defaults>
</compile_context>

<pallas_src>
import jax
import jax.numpy as jnp
from jax.experimental import pallas as pl
from jax.experimental.pallas import tpu as pltpu


def tweedie_mlp_kernel(x_ref, w1_ref, b1_ref, w2_ref, b2_ref, w3_ref, b3_ref,
                       out_ref):
    """Transposed layout: x_ref (D0, BT); w (out, in); b (out, 1); out (2*H3, BT)."""
    x = x_ref[...]
    # Layer 1: Linear + ReLU  (f32 MXU accumulation, f32 elementwise)
    h = jnp.dot(w1_ref[...], x, preferred_element_type=jnp.float32) + b1_ref[...]
    h = jnp.maximum(h, 0.0)
    # Layer 2: Linear + ReLU
    h = jnp.dot(w2_ref[...], h.astype(w2_ref.dtype),
                preferred_element_type=jnp.float32) + b2_ref[...]
    h = jnp.maximum(h, 0.0)
    # Layer 3 (final): Linear, no activation
    mu = jnp.dot(w3_ref[...], h.astype(w3_ref.dtype),
                 preferred_element_type=jnp.float32) + b3_ref[...]
    # Fused writeback: rows [0:H3) = mu, rows [H3:2*H3) = exp(mu).
    out_ref[...] = jnp.concatenate([mu, jnp.exp(mu)], axis=0).astype(out_ref.dtype)


def _round_up(n, m):
    return (n + m - 1) // m * m


def _pallas_forward(x_t, w1, b1, w2, b2, w3, b3, *, bt, single_buffer_weights):
    D0, n_pad = x_t.shape
    H1, H2, H3 = w1.shape[0], w2.shape[0], w3.shape[0]

    if single_buffer_weights:
        # Constant-index blocks don't need Pallas' default double buffer.
        wspec = lambda shape: pl.BlockSpec(shape, lambda i: (0, 0),
                                           pipeline_mode=pl.Buffered(1))
    else:
        wspec = lambda shape: pl.BlockSpec(shape, lambda i: (0, 0))

    return pl.pallas_call(
        tweedie_mlp_kernel,
        out_shape=jax.ShapeDtypeStruct((2 * H3, n_pad), jnp.float32),
        grid_spec=pltpu.PrefetchScalarGridSpec(
            num_scalar_prefetch=0,
            grid=(n_pad // bt,),
            in_specs=[
                pl.BlockSpec((D0, bt), lambda i: (0, i)),   # lane-dense x tile
                wspec((H1, D0)), wspec((H1, 1)),
                wspec((H2, H1)), wspec((H2, 1)),
                wspec((H3, H2)), wspec((H3, 1)),
            ],
            out_specs=pl.BlockSpec((2 * H3, bt), lambda i: (0, i)),
        ),
        compiler_params=pltpu.CompilerParams(
            dimension_semantics=("parallel",),      # megacore-shardable (v7x)
            vmem_limit_bytes=48 * 1024 * 1024),
    )(x_t, w1, b1, w2, b2, w3, b3)


def tweedie_net_forward(x, params, *, batch_tile=1024,
                        compute_dtype=jnp.float32):
    """x: (N, input_dim). params: PyTorch-layout w{i} (out, in), b{i} (out, 1)."""
    N, D0 = x.shape
    w1, b1 = params["w1"], params["b1"]
    w2, b2 = params["w2"], params["b2"]
    w3, b3 = params["w3"], params["b3"]
    H3 = w3.shape[0]
    assert w1.shape[1] == D0

    # Lane-dense batch tiling: batch on the lane axis, multiple of 128 lanes.
    bt = min(_round_up(int(batch_tile), 128), _round_up(N, 128))
    n_pad = _round_up(N, bt)

    x_t = x.T.astype(compute_dtype)                 # (D0, N): batch on lanes
    if n_pad != N:
        x_t = jnp.pad(x_t, ((0, 0), (0, n_pad - N)))

    # Matmul operands may be cast (bf16 on v6e/v7x halves HBM traffic); biases
    # and all elementwise/exp math stay f32 (v5e has no bf16 VPU/EUP path).
    w1c, w2c, w3c = (w.astype(compute_dtype) for w in (w1, w2, w3))
    b1f, b2f, b3f = (b.astype(jnp.float32) for b in (b1, b2, b3))

    try:
        out = _pallas_forward(x_t, w1c, b1f, w2c, b2f, w3c, b3f,
                              bt=bt, single_buffer_weights=True)
    except Exception:
        # pl.Buffered(1) not supported by this jax version: fall back to the
        # numerically identical default double-buffered weight blocks
        # (costs only a few extra KiB of VMEM).
        out = _pallas_forward(x_t, w1c, b1f, w2c, b2f, w3c, b3f,
                              bt=bt, single_buffer_weights=False)

    # Split the fused slab and return in the original (N, H3) layout.
    mu = out[:H3, :N].T
    expmu = out[H3:, :N].T
    return mu, expmu


def init_params(key, input_dim, layers):
    """PyTorch nn.Linear-style uniform(-1/sqrt(fan_in), 1/sqrt(fan_in)) init."""
    params = {}
    dims = [input_dim] + list(layers)
    for li in range(len(layers)):
        kw, kb, key = jax.random.split(key, 3)
        bound = 1.0 / jnp.sqrt(jnp.float32(dims[li]))
        # PyTorch layout: weight (out, in), bias (out, 1).
        params[f"w{li + 1}"] = jax.random.uniform(
            kw, (dims[li + 1], dims[li]), jnp.float32, -bound, bound)
        params[f"b{li + 1}"] = jax.random.uniform(
            kb, (dims[li + 1], 1), jnp.float32, -bound, bound)
    return params


def reference_forward(x, params):
    h = jnp.maximum(x @ params["w1"].T + params["b1"].T, 0.0)
    h = jnp.maximum(h @ params["w2"].T + params["b2"].T, 0.0)
    mu = h @ params["w3"].T + params["b3"].T
    return mu, jnp.exp(mu)


if __name__ == "__main__":
    key = jax.random.PRNGKey(0)
    input_dim = 32
    layers = (64, 32, 16)
    batch = 512          # small, but lane-dense; 2 grid steps at batch_tile=256

    kx, kp = jax.random.split(key)
    x = jax.random.normal(kx, (batch, input_dim), jnp.float32)
    params = init_params(kp, input_dim, layers)

    mu, expmu = tweedie_net_forward(x, params, batch_tile=256)
    mu = jax.block_until_ready(mu)
    expmu = jax.block_until_ready(expmu)

    mu_ref, expmu_ref = reference_forward(x, params)
    assert jnp.allclose(mu, mu_ref, atol=1e-4, rtol=1e-4)
    assert jnp.allclose(expmu, expmu_ref, atol=1e-4, rtol=1e-4)

    print("KERNEL_OK")
</pallas_src>

<mosaic_0001>
module attributes {stable_mosaic.version = 11 : i64} {
  func.func @tweedie_mlp_kernel(%arg0: i32, %arg1: memref<32x256xf32, #tpu.memory_space<vmem>>, %arg2: memref<64x32xf32, #tpu.memory_space<vmem>>, %arg3: memref<64x1xf32, #tpu.memory_space<vmem>>, %arg4: memref<32x64xf32, #tpu.memory_space<vmem>>, %arg5: memref<32x1xf32, #tpu.memory_space<vmem>>, %arg6: memref<16x32xf32, #tpu.memory_space<vmem>>, %arg7: memref<16x1xf32, #tpu.memory_space<vmem>>, %arg8: memref<32x256xf32, #tpu.memory_space<vmem>>) attributes {dimension_semantics = [#tpu.dimension_semantics<parallel>], iteration_bounds = array<i64: 2>, scalar_prefetch = 0 : i64, scratch_operands = 0 : i64, tpu.core_type = #tpu.core_type<tc>, window_params = [{transform_indices = @transform_0, window_bounds = array<i64: 32, 256>}, {pipeline_mode = #tpu.pipeline_mode<synchronous>, transform_indices = @transform_1, window_bounds = array<i64: 64, 32>}, {pipeline_mode = #tpu.pipeline_mode<synchronous>, transform_indices = @transform_2, window_bounds = array<i64: 64, 1>}, {pipeline_mode = #tpu.pipeline_mode<synchronous>, transform_indices = @transform_3, window_bounds = array<i64: 32, 64>}, {pipeline_mode = #tpu.pipeline_mode<synchronous>, transform_indices = @transform_4, window_bounds = array<i64: 32, 1>}, {pipeline_mode = #tpu.pipeline_mode<synchronous>, transform_indices = @transform_5, window_bounds = array<i64: 16, 32>}, {pipeline_mode = #tpu.pipeline_mode<synchronous>, transform_indices = @transform_6, window_bounds = array<i64: 16, 1>}, {transform_indices = @transform_7, window_bounds = array<i64: 32, 256>}]} {
    %c0 = arith.constant 0 : index
    %c0_0 = arith.constant 0 : index
    %0 = vector.load %arg1[%c0, %c0_0] : memref<32x256xf32, #tpu.memory_space<vmem>>, vector<32x256xf32>
    %c0_1 = arith.constant 0 : index
    %c0_2 = arith.constant 0 : index
    %1 = vector.load %arg2[%c0_1, %c0_2] : memref<64x32xf32, #tpu.memory_space<vmem>>, vector<64x32xf32>
    %cst = arith.constant dense<0.000000e+00> : vector<64x256xf32>
    %2 = tpu.matmul %1, %0, %cst {dimension_numbers = #tpu.dot_dimension_numbers<[1], [0], [0], [1], [0, 0, 1, 1], [], []>} : vector<64x32xf32>, vector<32x256xf32>, vector<64x256xf32> -> vector<64x256xf32>
    %c0_3 = arith.constant 0 : index
    %c0_4 = arith.constant 0 : index
    %3 = vector.load %arg3[%c0_3, %c0_4] : memref<64x1xf32, #tpu.memory_space<vmem>>, vector<64x1xf32>
    %4 = vector.broadcast %3 : vector<64x1xf32> to vector<64x256xf32>
    %5 = arith.addf %2, %4 : vector<64x256xf32>
    %cst_5 = arith.constant 0.000000e+00 : f32
    %6 = vector.broadcast %cst_5 : f32 to vector<64x256xf32>
    %7 = arith.maximumf %5, %6 : vector<64x256xf32>
    %c0_6 = arith.constant 0 : index
    %c0_7 = arith.constant 0 : index
    %8 = vector.load %arg4[%c0_6, %c0_7] : memref<32x64xf32, #tpu.memory_space<vmem>>, vector<32x64xf32>
    %cst_8 = arith.constant dense<0.000000e+00> : vector<32x256xf32>
    %9 = tpu.matmul %8, %7, %cst_8 {dimension_numbers = #tpu.dot_dimension_numbers<[1], [0], [0], [1], [0, 0, 1, 1], [], []>} : vector<32x64xf32>, vector<64x256xf32>, vector<32x256xf32> -> vector<32x256xf32>
    %c0_9 = arith.constant 0 : index
    %c0_10 = arith.constant 0 : index
    %10 = vector.load %arg5[%c0_9, %c0_10] : memref<32x1xf32, #tpu.memory_space<vmem>>, vector<32x1xf32>
    %11 = vector.broadcast %10 : vector<32x1xf32> to vector<32x256xf32>
    %12 = arith.addf %9, %11 : vector<32x256xf32>
    %cst_11 = arith.constant 0.000000e+00 : f32
    %13 = vector.broadcast %cst_11 : f32 to vector<32x256xf32>
    %14 = arith.maximumf %12, %13 : vector<32x256xf32>
    %c0_12 = arith.constant 0 : index
    %c0_13 = arith.constant 0 : index
    %15 = vector.load %arg6[%c0_12, %c0_13] : memref<16x32xf32, #tpu.memory_space<vmem>>, vector<16x32xf32>
    %cst_14 = arith.constant dense<0.000000e+00> : vector<16x256xf32>
    %16 = tpu.matmul %15, %14, %cst_14 {dimension_numbers = #tpu.dot_dimension_numbers<[1], [0], [0], [1], [0, 0, 1, 1], [], []>} : vector<16x32xf32>, vector<32x256xf32>, vector<16x256xf32> -> vector<16x256xf32>
    %c0_15 = arith.constant 0 : index
    %c0_16 = arith.constant 0 : index
    %17 = vector.load %arg7[%c0_15, %c0_16] : memref<16x1xf32, #tpu.memory_space<vmem>>, vector<16x1xf32>
    %18 = vector.broadcast %17 : vector<16x1xf32> to vector<16x256xf32>
    %19 = arith.addf %16, %18 : vector<16x256xf32>
    %20 = math.exp %19 : vector<16x256xf32>
    %21 = tpu.concatenate %19, %20 in 0 : vector<16x256xf32>, vector<16x256xf32> -> vector<32x256xf32>
    %c0_17 = arith.constant 0 : index
    %c0_18 = arith.constant 0 : index
    %22 = vector.load %arg8[%c0_17, %c0_18] : memref<32x256xf32, #tpu.memory_space<vmem>>, vector<32x256xf32>
    tpu.vector_store %arg8[%c0_17, %c0_18], %21 {strides = array<i32>} : memref<32x256xf32, #tpu.memory_space<vmem>>, vector<32x256xf32>,
    return
  }
  func.func @transform_0(%arg0: i32) -> (i32, i32) {
    %c0_i32 = arith.constant 0 : i32
    %c0_i32_0 = arith.constant 0 : i32
    return %c0_i32, %arg0 : i32, i32
  }
  func.func @transform_1(%arg0: i32) -> (i32, i32) {
    %c0_i32 = arith.constant 0 : i32
    %c0_i32_0 = arith.constant 0 : i32
    %c0_i32_1 = arith.constant 0 : i32
    return %c0_i32, %c0_i32_0 : i32, i32
  }
  func.func @transform_2(%arg0: i32) -> (i32, i32) {
    %c0_i32 = arith.constant 0 : i32
    %c0_i32_0 = arith.constant 0 : i32
    %c0_i32_1 = arith.constant 0 : i32
    return %c0_i32, %c0_i32_0 : i32, i32
  }
  func.func @transform_3(%arg0: i32) -> (i32, i32) {
    %c0_i32 = arith.constant 0 : i32
    %c0_i32_0 = arith.constant 0 : i32
    %c0_i32_1 = arith.constant 0 : i32
    return %c0_i32, %c0_i32_0 : i32, i32
  }
  func.func @transform_4(%arg0: i32) -> (i32, i32) {
    %c0_i32 = arith.constant 0 : i32
    %c0_i32_0 = arith.constant 0 : i32
    %c0_i32_1 = arith.constant 0 : i32
    return %c0_i32, %c0_i32_0 : i32, i32
  }
  func.func @transform_5(%arg0: i32) -> (i32, i32) {
    %c0_i32 = arith.constant 0 : i32
    %c0_i32_0 = arith.constant 0 : i32
    %c0_i32_1 = arith.constant 0 : i32
    return %c0_i32, %c0_i32_0 : i32, i32
  }
  func.func @transform_6(%arg0: i32) -> (i32, i32) {
    %c0_i32 = arith.constant 0 : i32
    %c0_i32_0 = arith.constant 0 : i32
    %c0_i32_1 = arith.constant 0 : i32
    return %c0_i32, %c0_i32_0 : i32, i32
  }
  func.func @transform_7(%arg0: i32) -> (i32, i32) {
    %c0_i32 = arith.constant 0 : i32
    %c0_i32_0 = arith.constant 0 : i32
    return %c0_i32, %arg0 : i32, i32
  }
}

module attributes {stable_mosaic.version = 11 : i64} {
  func.func @tweedie_mlp_kernel(%arg0: i32, %arg1: memref<32x256xf32, #tpu.memory_space<vmem>>, %arg2: memref<64x32xf32, #tpu.memory_space<vmem>>, %arg3: memref<64x1xf32, #tpu.memory_space<vmem>>, %arg4: memref<32x64xf32, #tpu.memory_space<vmem>>, %arg5: memref<32x1xf32, #tpu.memory_space<vmem>>, %arg6: memref<16x32xf32, #tpu.memory_space<vmem>>, %arg7: memref<16x1xf32, #tpu.memory_space<vmem>>, %arg8: memref<32x256xf32, #tpu.memory_space<vmem>>) attributes {dimension_semantics = [#tpu.dimension_semantics<parallel>], iteration_bounds = array<i64: 2>, scalar_prefetch = 0 : i64, scratch_operands = 0 : i64, tpu.core_type = #tpu.core_type<tc>, window_params = [{transform_indices = @transform_0, window_bounds = array<i64: 32, 256>}, {pipeline_mode = #tpu.pipeline_mode<synchronous>, transform_indices = @transform_1, window_bounds = array<i64: 64, 32>}, {pipeline_mode = #tpu.pipeline_mode<synchronous>, transform_indices = @transform_2, window_bounds = array<i64: 64, 1>}, {pipeline_mode = #tpu.pipeline_mode<synchronous>, transform_indices = @transform_3, window_bounds = array<i64: 32, 64>}, {pipeline_mode = #tpu.pipeline_mode<synchronous>, transform_indices = @transform_4, window_bounds = array<i64: 32, 1>}, {pipeline_mode = #tpu.pipeline_mode<synchronous>, transform_indices = @transform_5, window_bounds = array<i64: 16, 32>}, {pipeline_mode = #tpu.pipeline_mode<synchronous>, transform_indices = @transform_6, window_bounds = array<i64: 16, 1>}, {transform_indices = @transform_7, window_bounds = array<i64: 32, 256>}]} {
    %c0 = arith.constant 0 : index
    %c0_0 = arith.constant 0 : index
    %0 = vector.load %arg1[%c0, %c0_0] : memref<32x256xf32, #tpu.memory_space<vmem>>, vector<32x256xf32>
    %c0_1 = arith.constant 0 : index
    %c0_2 = arith.constant 0 : index
    %1 = vector.load %arg2[%c0_1, %c0_2] : memref<64x32xf32, #tpu.memory_space<vmem>>, vector<64x32xf32>
    %cst = arith.constant dense<0.000000e+00> : vector<64x256xf32>
    %2 = tpu.matmul %1, %0, %cst {dimension_numbers = #tpu.dot_dimension_numbers<[1], [0], [0], [1], [0, 0, 1, 1], [], []>} : vector<64x32xf32>, vector<32x256xf32>, vector<64x256xf32> -> vector<64x256xf32>
    %c0_3 = arith.constant 0 : index
    %c0_4 = arith.constant 0 : index
    %3 = vector.load %arg3[%c0_3, %c0_4] : memref<64x1xf32, #tpu.memory_space<vmem>>, vector<64x1xf32>
    %4 = vector.broadcast %3 : vector<64x1xf32> to vector<64x256xf32>
    %5 = arith.addf %2, %4 : vector<64x256xf32>
    %cst_5 = arith.constant 0.000000e+00 : f32
    %6 = vector.broadcast %cst_5 : f32 to vector<64x256xf32>
    %7 = arith.maximumf %5, %6 : vector<64x256xf32>
    %c0_6 = arith.constant 0 : index
    %c0_7 = arith.constant 0 : index
    %8 = vector.load %arg4[%c0_6, %c0_7] : memref<32x64xf32, #tpu.memory_space<vmem>>, vector<32x64xf32>
    %cst_8 = arith.constant dense<0.000000e+00> : vector<32x256xf32>
    %9 = tpu.matmul %8, %7, %cst_8 {dimension_numbers = #tpu.dot_dimension_numbers<[1], [0], [0], [1], [0, 0, 1, 1], [], []>} : vector<32x64xf32>, vector<64x256xf32>, vector<32x256xf32> -> vector<32x256xf32>
    %c0_9 = arith.constant 0 : index
    %c0_10 = arith.constant 0 : index
    %10 = vector.load %arg5[%c0_9, %c0_10] : memref<32x1xf32, #tpu.memory_space<vmem>>, vector<32x1xf32>
    %11 = vector.broadcast %10 : vector<32x1xf32> to vector<32x256xf32>
    %12 = arith.addf %9, %11 : vector<32x256xf32>
    %cst_11 = arith.constant 0.000000e+00 : f32
    %13 = vector.broadcast %cst_11 : f32 to vector<32x256xf32>
    %14 = arith.maximumf %12, %13 : vector<32x256xf32>
    %c0_12 = arith.constant 0 : index
    %c0_13 = arith.constant 0 : index
    %15 = vector.load %arg6[%c0_12, %c0_13] : memref<16x32xf32, #tpu.memory_space<vmem>>, vector<16x32xf32>
    %cst_14 = arith.constant dense<0.000000e+00> : vector<16x256xf32>
    %16 = tpu.matmul %15, %14, %cst_14 {dimension_numbers = #tpu.dot_dimension_numbers<[1], [0], [0], [1], [0, 0, 1, 1], [], []>} : vector<16x32xf32>, vector<32x256xf32>, vector<16x256xf32> -> vector<16x256xf32>
    %c0_15 = arith.constant 0 : index
    %c0_16 = arith.constant 0 : index
    %17 = vector.load %arg7[%c0_15, %c0_16] : memref<16x1xf32, #tpu.memory_space<vmem>>, vector<16x1xf32>
    %18 = vector.broadcast %17 : vector<16x1xf32> to vector<16x256xf32>
    %19 = arith.addf %16, %18 : vector<16x256xf32>
    %20 = math.exp %19 : vector<16x256xf32>
    %21 = tpu.concatenate %19, %20 in 0 : vector<16x256xf32>, vector<16x256xf32> -> vector<32x256xf32>
    %c0_17 = arith.constant 0 : index
    %c0_18 = arith.constant 0 : index
    %22 = vector.load %arg8[%c0_17, %c0_18] : memref<32x256xf32, #tpu.memory_space<vmem>>, vector<32x256xf32>
    tpu.vector_store %arg8[%c0_17, %c0_18], %21 {strides = array<i32>} : memref<32x256xf32, #tpu.memory_space<vmem>>, vector<32x256xf32>,
    return
  }
  func.func @transform_0(%arg0: i32) -> (i32, i32) {
    %c0_i32 = arith.constant 0 : i32
    %c0_i32_0 = arith.constant 0 : i32
    return %c0_i32, %arg0 : i32, i32
  }
  func.func @transform_1(%arg0: i32) -> (i32, i32) {
    %c0_i32 = arith.constant 0 : i32
    %c0_i32_0 = arith.constant 0 : i32
    %c0_i32_1 = arith.constant 0 : i32
    return %c0_i32, %c0_i32_0 : i32, i32
  }
  func.func @transform_2(%arg0: i32) -> (i32, i32) {
    %c0_i32 = arith.constant 0 : i32
    %c0_i32_0 = arith.constant 0 : i32
    %c0_i32_1 = arith.constant 0 : i32
    return %c0_i32, %c0_i32_0 : i32, i32
  }
  func.func @transform_3(%arg0: i32) -> (i32, i32) {
    %c0_i32 = arith.constant 0 : i32
    %c0_i32_0 = arith.constant 0 : i32
    %c0_i32_1 = arith.constant 0 : i32
    return %c0_i32, %c0_i32_0 : i32, i32
  }
  func.func @transform_4(%arg0: i32) -> (i32, i32) {
    %c0_i32 = arith.constant 0 : i32
    %c0_i32_0 = arith.constant 0 : i32
    %c0_i32_1 = arith.constant 0 : i32
    return %c0_i32, %c0_i32_0 : i32, i32
  }
  func.func @transform_5(%arg0: i32) -> (i32, i32) {
    %c0_i32 = arith.constant 0 : i32
    %c0_i32_0 = arith.constant 0 : i32
    %c0_i32_1 = arith.constant 0 : i32
    return %c0_i32, %c0_i32_0 : i32, i32
  }
  func.func @transform_6(%arg0: i32) -> (i32, i32) {
    %c0_i32 = arith.constant 0 : i32
    %c0_i32_0 = arith.constant 0 : i32
    %c0_i32_1 = arith.constant 0 : i32
    return %c0_i32, %c0_i32_0 : i32, i32
  }
  func.func @transform_7(%arg0: i32) -> (i32, i32) {
    %c0_i32 = arith.constant 0 : i32
    %c0_i32_0 = arith.constant 0 : i32
    return %c0_i32, %arg0 : i32, i32
  }
}

</mosaic_0001>

<bundles_post_ra>
// kernel: tpu_custom_call.1
= control target key start
LH: loop header
LB: loop body
LE: loop exit
PB: predicated region body
PF: predicated region fallthrough
CT: control target
= control target key end

     0   :  { %12 = vsyncpa [#allocation4], 0  ;;  %s1314_s0 = inlined_call_operand.vmem [shape: f32[32,512], index: 0, kind: input, shape index: {}]   ;;  %s1315_s1 = inlined_call_operand.vmem [shape: f32[64,32], index: 1, kind: input, shape index: {}]   ;;  %s1316_s2 = inlined_call_operand.vmem [shape: f32[64,1], index: 2, kind: input, shape index: {}]   ;;  %s1317_s3 = inlined_call_operand.vmem [shape: f32[32,64], index: 3, kind: input, shape index: {}]   ;;  %s1318_s4 = inlined_call_operand.vmem [shape: f32[32,1], index: 4, kind: input, shape index: {}]   ;;  %s1319_s5 = inlined_call_operand.vmem [shape: f32[16,32], index: 5, kind: input, shape index: {}]   ;;  %s1320_s6 = inlined_call_operand.vmem [shape: f32[16,1], index: 6, kind: input, shape index: {}]   ;;  %s1321_s7 = inlined_call_operand.hbm [shape: f32[32,512], index: 7, kind: output, shape index: {}]  }
   0x1   :  { %14 = vsyncpa [#allocation4 + $0x1], 0  ;;  %s1090_s24 = smov 0   ;;  %s1092_s25 = smov 0  }
   0x2   :  { %s1094_s26 = smov 0   ;;  %s1096_s27 = smov 0  }
   0x3 LB: > { %s863_s28 = sadd.s32 4294967295, %s1042_s27   ;;  %s864_s29 = sadd.s32 4294967294, %s1042_s27   ;;  %s1042_s27 = sphi %s1096_s27, %s1327_s27   ;;  %s1038_s26 = sphi %s1094_s26, %s1326_s26   ;;  %s1034_s25 = sphi %s1092_s25, %s1325_s25   ;;  %s1030_s24 = sphi %s1090_s24, %s1324_s24  }
   0x4   : > { %s1113_s30 = sadd.s32 1, %s1042_s27   ;;  %s27_s8 = sadd.s32 1, %s1038_s26 }
   0x5   : > { %s24_s9 = ssub.s32 %s1042_s27, %s1113_s30  ;;  %p34_p0 = scmp.ne.s32.totalorder %s1038_s26, %s1034_s25 }
   0x6   : > { %p25_p1 = scmp.eq.s32.totalorder %s24_s9, 0  ;;  %p35_p2 = scmp.eq.s32.totalorder %s1042_s27, 0 }
   0x7   : > { %p190_p3 = scmp.eq.s32.totalorder %s863_s28, 1  ;;  %p195_p4 = scmp.ne.s32.totalorder %s1034_s25, %s1030_s24 }
   0x8   : > { %s1126_s10 = scalar_select %p25_p1, %s1038_s26, %s27_s8  }
   0x9   : > { %p36_p5 = por %p35_p2, %p34_p0  ;;  %p1128_p6 = por %p190_p3, %p34_p0 }
   0xa   : > { %p196_p7 = scmp.eq.s32.totalorder %s864_s29, 1  ;;  %p866_p9 = scmp.ge.s32.totalorder %s1042_s27, 2 }
   0xc   : > { %p1132_p8 = por %p196_p7, %p195_p4  ;;  %230 = sbr.rel (%p866_p9) target bundleno = 27 (0x1b), region = 40 }
  0x13   : > { %233 = sbr.rel (!%p36_p5) target bundleno = 27 (0x1b), region = 44  ;;  %s235_s13 = sand.u32 (%p36_p5), 1, %s1038_s26  }
  0x14   : > { %s892_s14 = sshll.u32 (%p36_p5), %s1042_s27, 4  ;;  %s867_s15 = sshll.u32 (%p36_p5), %s235_s13, 6 }
  0x15   : > { %s240_s18 = scalar_lea.vmem (%p36_p5), %s1314_s0, %s892_s14  ;;  %s237_s19 = scalar_lea.vmem (%p36_p5), [#allocation2], %s867_s15 }
  0x16   : > { %v253_v0 = vld [vmem:[%s240_s18] sm:$0xff] (%p36_p5)  ;;  %v255_v1 = vld [vmem:[%s240_s18 + $0x8] sm:$0xff] (%p36_p5) }
  0x17   : > { %v257_v2 = vld [vmem:[%s240_s18 + $0x20] sm:$0xff] (%p36_p5)  ;;  %254 = vst [vmem:[%s237_s19] sm:$0xff] (%p36_p5), %v253_v0  ;;  %256 = vst [vmem:[%s237_s19 + $0x8] sm:$0xff] (%p36_p5), %v255_v1  ;;  %v259_v3 = vld [vmem:[%s240_s18 + $0x28] sm:$0xff] (%p36_p5) }
  0x18   : > { %258 = vst [vmem:[%s237_s19 + $0x10] sm:$0xff] (%p36_p5), %v257_v2  ;;  %v261_v4 = vld [vmem:[%s240_s18 + $0x40] sm:$0xff] (%p36_p5)  ;;  %v263_v5 = vld [vmem:[%s240_s18 + $0x48] sm:$0xff] (%p36_p5)  ;;  %260 = vst [vmem:[%s237_s19 + $0x18] sm:$0xff] (%p36_p5), %v259_v3 }
  0x19   : > { %262 = vst [vmem:[%s237_s19 + $0x20] sm:$0xff] (%p36_p5), %v261_v4  ;;  %264 = vst [vmem:[%s237_s19 + $0x28] sm:$0xff] (%p36_p5), %v263_v5  ;;  %v265_v6 = vld [vmem:[%s240_s18 + $0x60] sm:$0xff] (%p36_p5)  ;;  %v267_v7 = vld [vmem:[%s240_s18 + $0x68] sm:$0xff] (%p36_p5) }
  0x1a   : > { %266 = vst [vmem:[%s237_s19 + $0x30] sm:$0xff] %v265_v6  ;;  %268 = vst [vmem:[%s237_s19 + $0x38] sm:$0xff] %v267_v7 }
  0x1b PF: > { %p870_p10 = scmp.ge.s32.totalorder %s1042_s27, 1  ;;  %p273_p11 = scmp.lt.s32.totalorder %s1042_s27, 3 }
  0x1d   : > { %p274_p12 = pnand %p870_p10, %p273_p11 }
  0x1e   : > { %s280_s20 = sand.u32 (!%p274_p12), 1, %s1034_s25   ;;  %v1044_v8 = vmov (!%p274_p12), 0.0   ;;  %v1045_v9 = vmov (!%p274_p12), 0   ;;  %v329_v10 = vld [vmem:[%s1316_s2] sm:$0xff] (!%p274_p12)  ;;  %v331_v22 = vld [vmem:[%s1316_s2 + $0x10] sm:$0xff] (!%p274_p12)  ;;  %v330_v23 = vld [vmem:[%s1316_s2 + $0x8] sm:$0xff] (!%p274_p12) }
  0x1f   : > { %277 = sbr.rel (%p274_p12) target bundleno = 778 (0x30a), region = 67  ;;  %s1149_s21 = sshll.u32 (!%p274_p12), %s280_s20, 6  ;;  %466 = vmatprep.mubr.f32.mxu0 (!%p274_p12), %v1044_v8  ;;  %636 = vmatprep.mubr.f32.mxu1 (!%p274_p12), %v1044_v8  ;;  %v332_v25 = vld [vmem:[%s1316_s2 + $0x18] sm:$0xff] (!%p274_p12)  ;;  %v333_v26 = vld [vmem:[%s1316_s2 + $0x20] sm:$0xff] (!%p274_p12)  ;;  %vm377_vm0 = vcmask (!%p274_p12), 261120   ;;  %v334_v28 = vld [vmem:[%s1316_s2 + $0x28] sm:$0xff] (!%p274_p12) }
  0x20   : > { %970 = vset.pattern.permute.xlu0 (!%p274_p12), %v1045_v9  ;;  %971 = vset.pattern.permute.xlu1 (!%p274_p12), %v1045_v9  ;;  %s282_s29 = scalar_lea.vmem (!%p274_p12), [#allocation2], %s1149_s21  ;;  %v321_v27 = vld [vmem:[%s1315_s1] sm:$0xff] (!%p274_p12)  ;;  %v335_v29 = vld [vmem:[%s1316_s2 + $0x30] sm:$0xff] (!%p274_p12)  ;;  %v322_v30 = vld [vmem:[%s1315_s1 + $0x8] sm:$0xff] (!%p274_p12)  ;;  %vm559_vm1 = vcmask (!%p274_p12), 523264   ;;  %s310_s17 = scalar_lea.vmem (!%p274_p12), [#allocation3], %s1149_s21 }
  0x21   : > { %v314_v11 = vld [vmem:[%s282_s29 + $0x8] sm:$0xff] (!%p274_p12)  ;;  %v316_v12 = vld [vmem:[%s282_s29 + $0x18] sm:$0xff] (!%p274_p12)  ;;  %v313_v13 = vld [vmem:[%s282_s29] sm:$0xff] (!%p274_p12)  ;;  %339 = vperm.xlu0 (!%p274_p12), %970, %v329_v10   ;;  %349 = vperm.xlu1 (!%p274_p12), %971, %v331_v22   ;;  %s796_s21 = sshll.u32 (!%p274_p12), %s310_s17, 4  ;;  %s893_s18 = sshll.u32 (!%p274_p12), %s863_s28, 8  ;;  %s1263_s21 = int_to_ptr.vmem [resolvable:$true] %s796_s21 }
  0x22   : > { %v894_v14 = vpack.c.bf16 (!%p274_p12), %v316_v12, %v314_v11  ;;  %v315_v15 = vld [vmem:[%s282_s29 + $0x10] sm:$0xff] (!%p274_p12)  ;;  %v318_v16 = vld [vmem:[%s282_s29 + $0x28] sm:$0xff] (!%p274_p12)  ;;  %v320_v17 = vld [vmem:[%s282_s29 + $0x38] sm:$0xff] (!%p274_p12)  ;;  %s1268_s23 = scalar_lea.hbm (!%p274_p12), %s1321_s7, %s893_s18  ;;  %s980_s28 = scalar_lea.vmem (!%p274_p12), %s1263_s21, 1024 }
  0x23   : > { %v896_v18 = vpack.c.bf16 (!%p274_p12), %v315_v15, %v313_v13  ;;  %v898_v19 = vpack.c.bf16 (!%p274_p12), %v320_v17, %v318_v16  ;;  %v317_v20 = vld [vmem:[%s282_s29 + $0x20] sm:$0xff] (!%p274_p12)  ;;  %v319_v21 = vld [vmem:[%s282_s29 + $0x30] sm:$0xff] (!%p274_p12)  ;;  %v336_v31 = vld [vmem:[%s1316_s2 + $0x38] sm:$0xff] (!%p274_p12)  ;;  %s1272_s29 = scalar_lea.sflag (!%p274_p12), [#allocation4], %s280_s20  ;;  %p981_p13 = scmp.ne.s32.totalorder (!%p274_p12), %s1263_s21, %s980_s28 }
  0x24   : > { %895 = vmatprep.subr.bf16.mxu0 (!%p274_p12), %v894_v14  ;;  %v900_v24 = vpack.c.bf16 (!%p274_p12), %v319_v21, %v317_v20  ;;  %v535_v32 = vld [vmem:[%s1318_s4] sm:$0xff] (!%p274_p12)  ;;  %v323_v33 = vld [vmem:[%s1315_s1 + $0x10] sm:$0xff] (!%p274_p12)  ;;  %v536_v34 = vld [vmem:[%s1318_s4 + $0x8] sm:$0xff] (!%p274_p12)  ;;  %s1046_s8 = smov (!%p274_p12), [#allocation3]  }
  0x25   : > { %897 = vmatpush1.bf16.msra.mxu0 (!%p274_p12), %v896_v18  ;;  %344 = vperm.xlu0 (!%p274_p12), %970, %v330_v23   ;;  %v537_v35 = vld [vmem:[%s1318_s4 + $0x10] sm:$0xff] (!%p274_p12)  ;;  %v324_v36 = vld [vmem:[%s1315_s1 + $0x18] sm:$0xff] (!%p274_p12)  ;;  %v671_v38 = vld [vmem:[%s1320_s6] sm:$0xff] (!%p274_p12)  ;;  %p982_p0 = pnand (!%p274_p12), %p981_p13, %p1128_p6  ;;  %s984_s9 = sshll.u32 (!%p274_p12), %s1046_s8, 4  ;;  %s985_s9 = int_to_ptr.vmem [resolvable:$false] %s984_s9 }
  0x26   : > { %899 = vmatprep.subr.bf16.mxu0 %v898_v19  ;;  %354 = vperm.xlu1 %971, %v332_v25   ;;  %v538_v37 = vld [vmem:[%s1318_s4 + $0x18] sm:$0xff]  ;;  %v325_v39 = vld [vmem:[%s1315_s1 + $0x20] sm:$0xff]  ;;  %v672_v40 = vld [vmem:[%s1320_s6 + $0x8] sm:$0xff]  ;;  %s986_s13 = scalar_lea.vmem %s985_s9, 2048  ;;  %p987_p2 = scmp.lt.s32.totalorder %s1263_s21, %s985_s9 }
  0x27   : > { %v326_v41 = vld [vmem:[%s1315_s1 + $0x28] sm:$0xff]  ;;  %v327_v42 = vld [vmem:[%s1315_s1 + $0x30] sm:$0xff]  ;;  %v328_v43 = vld [vmem:[%s1315_s1 + $0x38] sm:$0xff]  ;;  %p983_p1 = pneg %p982_p0  ;;  %p988_p3 = scmp.lt.s32.totalorder %s986_s13, %s980_s28 }
  0x29   : > { %901 = vmatpush1.bf16.msra.mxu0 %v900_v24  ;;  %359 = vperm.xlu0 %970, %v333_v26   ;;  %p989_p4 = por %p988_p3, %p987_p2 }
  0x2a   : > { %364 = vperm.xlu1 %971, %v334_v28  }
  0x2b   : > { %p990_p5 = pnand %p989_p4, %p983_p1 }
  0x2c   : > { %873 = vmatmul.mubr.msk.f32.vlgmr.msra.gmra.mrb[0].mxu0 %vm377_vm0, %v321_v27 }
  0x2d   : > { %472 = vmatprep.mubr.f32.mxu0 %v1044_v8  ;;  %369 = vperm.xlu0 %970, %v335_v29  }
  0x2e   : > { %374 = vperm.xlu1 %971, %v336_v31  }
  0x30   : > { %874 = vmatmul.mubr.msk.f32.gmra.mrb[2].mxu0 %vm377_vm0, %v322_v30 }
  0x31   : > { %478 = vmatprep.mubr.f32.mxu0 %v1044_v8  ;;  %541 = vperm.xlu0 %970, %v535_v32  }
  0x32   : > { %546 = vperm.xlu1 %971, %v536_v34  }
  0x34   : > { %875 = vmatmul.mubr.msk.f32.gmra.mrb[4].mxu0 %vm377_vm0, %v323_v33 }
  0x35   : > { %484 = vmatprep.mubr.f32.mxu0 %v1044_v8  ;;  %551 = vperm.xlu0 %970, %v537_v35  }
  0x36   : > { %556 = vperm.xlu1 %971, %v538_v37  }
  0x38   : > { %876 = vmatmul.mubr.msk.f32.gmra.mrb[6].mxu0 %vm377_vm0, %v324_v36 }
  0x39   : > { %490 = vmatprep.mubr.f32.mxu0 %v1044_v8  ;;  %675 = vperm.xlu0 %970, %v671_v38  }
  0x3a   : > { %680 = vperm.xlu1 %971, %v672_v40  }
  0x3c   : > { %877 = vmatmul.mubr.msk.f32.gmra.mrb[8].mxu0 %vm377_vm0, %v325_v39 }
  0x3d   : > { %496 = vmatprep.mubr.f32.mxu0 %v1044_v8 }
  0x40   : > { %878 = vmatmul.mubr.msk.f32.gmra.mrb[10].mxu0 %vm377_vm0, %v326_v41 }
  0x41   : > { %502 = vmatprep.mubr.f32.mxu0 %v1044_v8 }
  0x44   : > { %879 = vmatmul.mubr.msk.f32.gmra.mrb[12].mxu0 %vm377_vm0, %v327_v42 }
  0x45   : > { %508 = vmatprep.mubr.f32.mxu0 %v1044_v8 }
  0x48   : > { %880 = vmatmul.mubr.msk.f32.gmra.mrb[14].mxu0 %vm377_vm0, %v328_v43 }
  0xa0   : > { %v340_v44 = vpop.permute.xlu0 %339  ;;  %v350_v53 = vpop.permute.xlu1 %349 }
  0xa4   : > { %v345_v48 = vpop.permute.xlu0 %344 }
  0xa5   : > { %v355_v0 = vpop.permute.xlu1 %354 }
  0xa8   : > { %v360_v14 = vpop.permute.xlu0 %359 }
  0xa9   : > { %v365_v17 = vpop.permute.xlu1 %364 }
  0xac   : > { %v370_v30 = vpop.permute.xlu0 %369 }
  0xad   : > { %v375_v33 = vpop.permute.xlu1 %374 }
  0xff   : > { %v468_v45 = vpop.f32.mrb[0].mxu0 }
 0x100   : > { %v470_v46 = vpop.f32.mrb[1].mxu0  ;;  %v469_v47 = vadd.f32 %v468_v45, %v340_v44  ;;  %v531_v45 = vld [vmem:[%s1317_s3] sm:$0xff] }
 0x101   : > { %v471_v49 = vadd.f32 %v470_v46, %v340_v44  ;;  %v532_v46 = vld [vmem:[%s1317_s3 + $0x8] sm:$0xff] }
 0x102   : > { %v515_v55 = vmax.f32 %v469_v47, 0.0  ;;  %v533_v47 = vld [vmem:[%s1317_s3 + $0x10] sm:$0xff] }
 0x103   : > { %v474_v50 = vpop.f32.mrb[2].mxu0  ;;  %v516_v57 = vmax.f32 %v471_v49, 0.0 }
 0x104   : > { %v475_v51 = vadd.f32 %v474_v50, %v345_v48  ;;  %v476_v52 = vpop.f32.mrb[3].mxu0 }
 0x105   : > { %v477_v54 = vadd.f32 %v476_v52, %v345_v48  ;;  %v534_v48 = vld [vmem:[%s1317_s3 + $0x18] sm:$0xff] }
 0x106   : > { %v517_v56 = vmax.f32 %v475_v51, 0.0  ;;  %v542_v51 = vpop.permute.xlu0 %541 }
 0x107   : > { %v518_v58 = vmax.f32 %v477_v54, 0.0  ;;  %v480_v59 = vpop.f32.mrb[4].mxu0 }
 0x108   : > { %v482_v60 = vpop.f32.mrb[5].mxu0  ;;  %v904_v61 = vpack.c.bf16 %v517_v56, %v515_v55  ;;  %v481_v63 = vadd.f32 %v480_v59, %v350_v53 }
 0x109   : > { %v902_v62 = vpack.c.bf16 %v518_v58, %v516_v57  ;;  %v483_v1 = vadd.f32 %v482_v60, %v350_v53  ;;  %v547_v53 = vpop.permute.xlu1 %546 }
 0x10a   : > { %v519_v6 = vmax.f32 %v481_v63, 0.0 }
 0x10b   : > { %v486_v2 = vpop.f32.mrb[6].mxu0  ;;  %903 = vmatprep.subr.bf16.mxu1 %v902_v62  ;;  %v520_v9 = vmax.f32 %v483_v1, 0.0 }
 0x10c   : > { %v487_v3 = vadd.f32 %v486_v2, %v355_v0  ;;  %v488_v4 = vpop.f32.mrb[7].mxu0  ;;  %905 = vmatpush1.bf16.msra.mxu1 %v904_v61  ;;  %v552_v2 = vpop.permute.xlu0 %551 }
 0x10d   : > { %v489_v5 = vadd.f32 %v488_v4, %v355_v0 }
 0x10e   : > { %v521_v7 = vmax.f32 %v487_v3, 0.0 }
 0x10f   : > { %v522_v10 = vmax.f32 %v489_v5, 0.0  ;;  %v492_v11 = vpop.f32.mrb[8].mxu0  ;;  %v557_v5 = vpop.permute.xlu1 %556 }
 0x110   : > { %v908_v12 = vpack.c.bf16 %v521_v7, %v519_v6  ;;  %v494_v13 = vpop.f32.mrb[9].mxu0  ;;  %v493_v16 = vadd.f32 %v492_v11, %v360_v14 }
 0x111   : > { %v906_v15 = vpack.c.bf16 %v522_v10, %v520_v9  ;;  %v495_v18 = vadd.f32 %v494_v13, %v360_v14 }
 0x112   : > { %v523_v23 = vmax.f32 %v493_v16, 0.0 }
 0x113   : > { %v498_v19 = vpop.f32.mrb[10].mxu0  ;;  %907 = vmatprep.subr.bf16.mxu1 %v906_v15  ;;  %v524_v25 = vmax.f32 %v495_v18, 0.0  ;;  %v669_v18 = vld [vmem:[%s1319_s5] sm:$0xff] }
 0x114   : > { %v499_v20 = vadd.f32 %v498_v19, %v365_v17  ;;  %v500_v21 = vpop.f32.mrb[11].mxu0  ;;  %909 = vmatpush1.bf16.msra.mxu1 %v908_v12  ;;  %v670_v19 = vld [vmem:[%s1319_s5 + $0x8] sm:$0xff] }
 0x115   : > { %v501_v22 = vadd.f32 %v500_v21, %v365_v17 }
 0x116   : > { %v525_v24 = vmax.f32 %v499_v20, 0.0  ;;  %v676_v20 = vpop.permute.xlu0 %675 }
 0x117   : > { %v526_v26 = vmax.f32 %v501_v22, 0.0  ;;  %v504_v27 = vpop.f32.mrb[12].mxu0 }
 0x118   : > { %v912_v28 = vpack.c.bf16 %v525_v24, %v523_v23  ;;  %v506_v29 = vpop.f32.mrb[13].mxu0  ;;  %v505_v32 = vadd.f32 %v504_v27, %v370_v30 }
 0x119   : > { %v910_v31 = vpack.c.bf16 %v526_v26, %v524_v25  ;;  %v507_v34 = vadd.f32 %v506_v29, %v370_v30  ;;  %v681_v26 = vpop.permute.xlu1 %680 }
 0x11a   : > { %v527_v39 = vmax.f32 %v505_v32, 0.0 }
 0x11b   : > { %v510_v35 = vpop.f32.mrb[14].mxu0  ;;  %911 = vmatprep.subr.bf16.mxu1 %v910_v31  ;;  %v528_v41 = vmax.f32 %v507_v34, 0.0 }
 0x11c   : > { %v511_v36 = vadd.f32 %v510_v35, %v375_v33  ;;  %v512_v37 = vpop.f32.mrb[15].mxu0  ;;  %913 = vmatpush1.bf16.msra.mxu1 %v912_v28 }
 0x11d   : > { %v513_v38 = vadd.f32 %v512_v37, %v375_v33 }
 0x11e   : > { %v529_v40 = vmax.f32 %v511_v36, 0.0 }
 0x11f   : > { %v530_v42 = vmax.f32 %v513_v38, 0.0 }
 0x120   : > { %v916_v43 = vpack.c.bf16 %v529_v40, %v527_v39 }
 0x121   : > { %v914_v44 = vpack.c.bf16 %v530_v42, %v528_v41 }
 0x123   : > { %915 = vmatprep.subr.bf16.mxu1 %v914_v44 }
 0x124   : > { %917 = vmatpush1.bf16.msra.mxu1 %v916_v43 }
 0x127   : > { %881 = vmatmul.mubr.msk.f32.vlgmr.msra.gmra.mrb[0].mxu1 %vm559_vm1, %v531_v45 }
 0x128   : > { %642 = vmatprep.mubr.f32.mxu1 %v1044_v8 }
 0x12b   : > { %882 = vmatmul.mubr.msk.f32.gmra.mrb[2].mxu1 %vm559_vm1, %v532_v46 }
 0x12c   : > { %648 = vmatprep.mubr.f32.mxu1 %v1044_v8 }
 0x12f   : > { %883 = vmatmul.mubr.msk.f32.gmra.mrb[4].mxu1 %vm559_vm1, %v533_v47 }
 0x130   : > { %654 = vmatprep.mubr.f32.mxu1 %v1044_v8 }
 0x133   : > { %884 = vmatmul.mubr.msk.f32.gmra.mrb[6].mxu1 %vm559_vm1, %v534_v48 }
 0x134   : > { %753 = vmatprep.mubr.f32.mxu1 %v1044_v8 }
 0x1fa   : > { %v638_v49 = vpop.f32.mrb[0].mxu1 }
 0x1fb   : > { %v640_v50 = vpop.f32.mrb[1].mxu1  ;;  %v639_v52 = vadd.f32 %v638_v49, %v542_v51 }
 0x1fc   : > { %v641_v54 = vadd.f32 %v640_v50, %v542_v51 }
 0x1fd   : > { %v661_v59 = vmax.f32 %v639_v52, 0.0 }
 0x1fe   : > { %v644_v55 = vpop.f32.mrb[2].mxu1  ;;  %v662_v61 = vmax.f32 %v641_v54, 0.0 }
 0x1ff   : > { %v645_v56 = vadd.f32 %v644_v55, %v547_v53  ;;  %v646_v57 = vpop.f32.mrb[3].mxu1 }
 0x200   : > { %v647_v58 = vadd.f32 %v646_v57, %v547_v53 }
 0x201   : > { %v663_v60 = vmax.f32 %v645_v56, 0.0 }
 0x202   : > { %v664_v62 = vmax.f32 %v647_v58, 0.0  ;;  %v650_v63 = vpop.f32.mrb[4].mxu1 }
 0x203   : > { %v920_v0 = vpack.c.bf16 %v663_v60, %v661_v59  ;;  %v652_v1 = vpop.f32.mrb[5].mxu1  ;;  %v651_v4 = vadd.f32 %v650_v63, %v552_v2 }
 0x204   : > { %v918_v3 = vpack.c.bf16 %v664_v62, %v662_v61  ;;  %v653_v6 = vadd.f32 %v652_v1, %v552_v2 }
 0x205   : > { %v665_v12 = vmax.f32 %v651_v4, 0.0 }
 0x206   : > { %v656_v7 = vpop.f32.mrb[6].mxu1  ;;  %919 = vmatprep.subr.bf16.mxu1 %v918_v3  ;;  %v666_v14 = vmax.f32 %v653_v6, 0.0 }
 0x207   : > { %v657_v9 = vadd.f32 %v656_v7, %v557_v5  ;;  %v658_v10 = vpop.f32.mrb[7].mxu1  ;;  %921 = vmatpush1.bf16.msra.mxu1 %v920_v0 }
 0x208   : > { %v659_v11 = vadd.f32 %v658_v10, %v557_v5 }
 0x209   : > { %v667_v13 = vmax.f32 %v657_v9, 0.0 }
 0x20a   : > { %v668_v15 = vmax.f32 %v659_v11, 0.0 }
 0x20b   : > { %v924_v16 = vpack.c.bf16 %v667_v13, %v665_v12 }
 0x20c   : > { %v922_v17 = vpack.c.bf16 %v668_v15, %v666_v14 }
 0x20e   : > { %923 = vmatprep.subr.bf16.mxu1 %v922_v17 }
 0x20f   : > { %925 = vmatpush1.bf16.msra.mxu1 %v924_v16 }
 0x212   : > { %885 = vmatmul.mubr.msk.f32.vlgmr.msra.gmra.mrb[8].mxu1 %vm377_vm0, %v669_v18 }
 0x213   : > { %759 = vmatprep.mubr.f32.mxu1 %v1044_v8 }
 0x216   : > { %886 = vmatmul.mubr.msk.f32.gmra.mrb[10].mxu1 %vm377_vm0, %v670_v19 }
 0x2e5   : > { %v755_v21 = vpop.f32.mrb[8].mxu1 }
 0x2e6   : > { %v756_v22 = vadd.f32 %v755_v21, %v676_v20  ;;  %v757_v23 = vpop.f32.mrb[9].mxu1 }
 0x2e7   : > { %v758_v24 = vadd.f32 %v757_v23, %v676_v20 }
 0x2e8   : > { %v766_v25 = vmul.f32 1.442695, %v756_v22  ;;  %774 = vst [vmem:[%s310_s17] sm:$0xff] %v756_v22 }
 0x2e9   : > { %v768_v27 = vmul.f32 1.442695, %v758_v24  ;;  %775 = vst [vmem:[%s310_s17 + $0x8] sm:$0xff] %v758_v24  ;;  %v761_v28 = vpop.f32.mrb[10].mxu1 }
 0x2ea   : > { %972 = vpow2.f32 %v766_v25  ;;  %v762_v8 = vadd.f32 %v761_v28, %v681_v26  ;;  %v763_v29 = vpop.f32.mrb[11].mxu1 }
 0x2eb   : > { %974 = vpow2.f32 %v768_v27  ;;  %v764_v30 = vadd.f32 %v763_v29, %v681_v26 }
 0x2ec   : > { %v770_v31 = vmul.f32 1.442695, %v762_v8  ;;  %776 = vst [vmem:[%s310_s17 + $0x10] sm:$0xff] %v762_v8 }
 0x2ed   : > { %v772_v32 = vmul.f32 1.442695, %v764_v30  ;;  %777 = vst [vmem:[%s310_s17 + $0x18] sm:$0xff] %v764_v30 }
 0x2ee   : > { %976 = vpow2.f32 %v770_v31 }
 0x2ef   : > { %978 = vpow2.f32 %v772_v32 }
 0x2f4   : > { %v973_v33 = vpop.eup %972 }
 0x2f5   : > { %v975_v34 = vpop.eup %974  ;;  %778 = vst [vmem:[%s310_s17 + $0x20] sm:$0xff] %v973_v33 }
 0x2f6   : > { %779 = vst [vmem:[%s310_s17 + $0x28] sm:$0xff] %v975_v34 }
 0x2f8   : > { %v977_v35 = vpop.eup %976 }
 0x2f9   : > { %v979_v36 = vpop.eup %978  ;;  %780 = vst [vmem:[%s310_s17 + $0x30] sm:$0xff] %v977_v35 }
 0x2fa   : > { %781 = vst [vmem:[%s310_s17 + $0x38] sm:$0xff] %v979_v36 }
 0x2fb   : > { %993 = shalt.err (!%p990_p5)
}
 0x2fc   : > { %s994_s20 = scalar_lea.hbm %s1268_s23, 1024  ;;  %s998_s16 = scalar_lea.hbm %s1321_s7, 2048 }
 0x2fd   : > { %p995_p7 = scmp.ne.s32.totalorder %s1268_s23, %s994_s20  ;;  %p999_p12 = scmp.lt.u32.totalorder %s1268_s23, %s1321_s7 }
 0x2fe   : > { %p1000_p13 = scmp.lt.u32.totalorder %s998_s16, %s994_s20  ;;  %p1002_p1 = scmp.lt.u32.totalorder %s994_s20, %s1268_s23 }
 0x2ff   : > { %p996_p10 = pnand %p995_p7, %p1128_p6 }
 0x300   : > { %p1001_p0 = por %p1000_p13, %p999_p12 }
 0x301   : > { %p997_p11 = pneg %p996_p10 }
 0x302   : > { %p1003_p2 = por %p1002_p1, %p1001_p0 }
 0x304   : > { %p1004_p3 = pnand %p1003_p2, %p997_p11 }
 0x306   : > { %1007 = shalt.err (!%p1004_p3)
}
 0x307   : > { %s1047_s19 = smov 256   ;;  %s1048_s22 = smov 512  }
 0x308   : > { %s1049_s28 = smov 16  }
 0x309   : > { %926 = dma.vmem_to_hbm [thread:$0]  (%p1128_p6), %s1263_s21, 1024, %s1268_s23, %s1272_s29, %s1047_s19, %s1048_s22, %s1049_s28  }
 0x30a PF: > { %s811_s8 = sand.u32 1, %s1030_s24   ;;  %p929_p4 = pnand %p866_p9, %p1132_p8 }
 0x30b   : > { %s812_s9 = scalar_lea.sflag [#allocation4], %s811_s8 }
 0x30c   : > { %1025 = dma.done.wait (!%p929_p4), %s812_s9, 1024  }
 0x30d   : > { %1027 = vsyncadd (!%p929_p4), %s812_s9, 4294966272  ;;  %p17_p5 = scmp.ge.s32.totalorder %s1113_s30, 4   ;;  %s1324_s24 = smov %s1034_s25 }
 0x30e   : > { %s1325_s25 = smov %s1038_s26  ;;  %s1326_s26 = smov %s1126_s10 }
 0x30f   : > { %s1327_s27 = smov %s1113_s30  ;;  %19 = sbr.rel (!%p17_p5) target bundleno = 3 (0x3), region = 111 }
 0x316   :  { %817 = vsyncpa [#allocation4], 1 }
 0x317   :  { %819 = vsyncpa [#allocation4 + $0x1], 1 }

// kernel: tpu_custom_call.1
= control target key start
LH: loop header
LB: loop body
LE: loop exit
PB: predicated region body
PF: predicated region fallthrough
CT: control target
= control target key end

     0   :  { %12 = vsyncpa [#allocation4], 0  ;;  %s1314_s0 = inlined_call_operand.vmem [shape: f32[32,512], index: 0, kind: input, shape index: {}]   ;;  %s1315_s1 = inlined_call_operand.vmem [shape: f32[64,32], index: 1, kind: input, shape index: {}]   ;;  %s1316_s2 = inlined_call_operand.vmem [shape: f32[64,1], index: 2, kind: input, shape index: {}]   ;;  %s1317_s3 = inlined_call_operand.vmem [shape: f32[32,64], index: 3, kind: input, shape index: {}]   ;;  %s1318_s4 = inlined_call_operand.vmem [shape: f32[32,1], index: 4, kind: input, shape index: {}]   ;;  %s1319_s5 = inlined_call_operand.vmem [shape: f32[16,32], index: 5, kind: input, shape index: {}]   ;;  %s1320_s6 = inlined_call_operand.vmem [shape: f32[16,1], index: 6, kind: input, shape index: {}]   ;;  %s1321_s7 = inlined_call_operand.hbm [shape: f32[32,512], index: 7, kind: output, shape index: {}]  }
   0x1   :  { %14 = vsyncpa [#allocation4 + $0x1], 0  ;;  %s1090_s24 = smov 0   ;;  %s1092_s25 = smov 0  }
   0x2   :  { %s1094_s26 = smov 0   ;;  %s1096_s27 = smov 0  }
   0x3 LB: > { %s863_s28 = sadd.s32 4294967295, %s1042_s27   ;;  %s864_s29 = sadd.s32 4294967294, %s1042_s27   ;;  %s1042_s27 = sphi %s1096_s27, %s1327_s27   ;;  %s1038_s26 = sphi %s1094_s26, %s1326_s26   ;;  %s1034_s25 = sphi %s1092_s25, %s1325_s25   ;;  %s1030_s24 = sphi %s1090_s24, %s1324_s24  }
   0x4   : > { %s1113_s30 = sadd.s32 1, %s1042_s27   ;;  %s27_s8 = sadd.s32 1, %s1038_s26 }
   0x5   : > { %s24_s9 = ssub.s32 %s1042_s27, %s1113_s30  ;;  %p34_p0 = scmp.ne.s32.totalorder %s1038_s26, %s1034_s25 }
   0x6   : > { %p25_p1 = scmp.eq.s32.totalorder %s24_s9, 0  ;;  %p35_p2 = scmp.eq.s32.totalorder %s1042_s27, 0 }
   0x7   : > { %p190_p3 = scmp.eq.s32.totalorder %s863_s28, 1  ;;  %p195_p4 = scmp.ne.s32.totalorder %s1034_s25, %s1030_s24 }
   0x8   : > { %s1126_s10 = scalar_select %p25_p1, %s1038_s26, %s27_s8  }
   0x9   : > { %p36_p5 = por %p35_p2, %p34_p0  ;;  %p1128_p6 = por %p190_p3, %p34_p0 }
   0xa   : > { %p196_p7 = scmp.eq.s32.totalorder %s864_s29, 1  ;;  %p866_p9 = scmp.ge.s32.totalorder %s1042_s27, 2 }
   0xc   : > { %p1132_p8 = por %p196_p7, %p195_p4  ;;  %230 = sbr.rel (%p866_p9) target bundleno = 27 (0x1b), region = 40 }
  0x13   : > { %233 = sbr.rel (!%p36_p5) target bundleno = 27 (0x1b), region = 44  ;;  %s235_s13 = sand.u32 (%p36_p5), 1, %s1038_s26  }
  0x14   : > { %s892_s14 = sshll.u32 (%p36_p5), %s1042_s27, 4  ;;  %s867_s15 = sshll.u32 (%p36_p5), %s235_s13, 6 }
  0x15   : > { %s240_s18 = scalar_lea.vmem (%p36_p5), %s1314_s0, %s892_s14  ;;  %s237_s19 = scalar_lea.vmem (%p36_p5), [#allocation2], %s867_s15 }
  0x16   : > { %v253_v0 = vld [vmem:[%s240_s18] sm:$0xff] (%p36_p5)  ;;  %v255_v1 = vld [vmem:[%s240_s18 + $0x8] sm:$0xff] (%p36_p5) }
  0x17   : > { %v257_v2 = vld [vmem:[%s240_s18 + $0x20] sm:$0xff] (%p36_p5)  ;;  %254 = vst [vmem:[%s237_s19] sm:$0xff] (%p36_p5), %v253_v0  ;;  %256 = vst [vmem:[%s237_s19 + $0x8] sm:$0xff] (%p36_p5), %v255_v1  ;;  %v259_v3 = vld [vmem:[%s240_s18 + $0x28] sm:$0xff] (%p36_p5) }
  0x18   : > { %258 = vst [vmem:[%s237_s19 + $0x10] sm:$0xff] (%p36_p5), %v257_v2  ;;  %v261_v4 = vld [vmem:[%s240_s18 + $0x40] sm:$0xff] (%p36_p5)  ;;  %v263_v5 = vld [vmem:[%s240_s18 + $0x48] sm:$0xff] (%p36_p5)  ;;  %260 = vst [vmem:[%s237_s19 + $0x18] sm:$0xff] (%p36_p5), %v259_v3 }
  0x19   : > { %262 = vst [vmem:[%s237_s19 + $0x20] sm:$0xff] (%p36_p5), %v261_v4  ;;  %264 = vst [vmem:[%s237_s19 + $0x28] sm:$0xff] (%p36_p5), %v263_v5  ;;  %v265_v6 = vld [vmem:[%s240_s18 + $0x60] sm:$0xff] (%p36_p5)  ;;  %v267_v7 = vld [vmem:[%s240_s18 + $0x68] sm:$0xff] (%p36_p5) }
  0x1a   : > { %266 = vst [vmem:[%s237_s19 + $0x30] sm:$0xff] %v265_v6  ;;  %268 = vst [vmem:[%s237_s19 + $0x38] sm:$0xff] %v267_v7 }
  0x1b PF: > { %p870_p10 = scmp.ge.s32.totalorder %s1042_s27, 1  ;;  %p273_p11 = scmp.lt.s32.totalorder %s1042_s27, 3 }
  0x1d   : > { %p274_p12 = pnand %p870_p10, %p273_p11 }
  0x1e   : > { %s280_s20 = sand.u32 (!%p274_p12), 1, %s1034_s25   ;;  %v1044_v8 = vmov (!%p274_p12), 0.0   ;;  %v1045_v9 = vmov (!%p274_p12), 0   ;;  %v329_v10 = vld [vmem:[%s1316_s2] sm:$0xff] (!%p274_p12)  ;;  %v331_v22 = vld [vmem:[%s1316_s2 + $0x10] sm:$0xff] (!%p274_p12)  ;;  %v330_v23 = vld [vmem:[%s1316_s2 + $0x8] sm:$0xff] (!%p274_p12) }
  0x1f   : > { %277 = sbr.rel (%p274_p12) target bundleno = 778 (0x30a), region = 67  ;;  %s1149_s21 = sshll.u32 (!%p274_p12), %s280_s20, 6  ;;  %466 = vmatprep.mubr.f32.mxu0 (!%p274_p12), %v1044_v8  ;;  %636 = vmatprep.mubr.f32.mxu1 (!%p274_p12), %v1044_v8  ;;  %v332_v25 = vld [vmem:[%s1316_s2 + $0x18] sm:$0xff] (!%p274_p12)  ;;  %v333_v26 = vld [vmem:[%s1316_s2 + $0x20] sm:$0xff] (!%p274_p12)  ;;  %vm377_vm0 = vcmask (!%p274_p12), 261120   ;;  %v334_v28 = vld [vmem:[%s1316_s2 + $0x28] sm:$0xff] (!%p274_p12) }
  0x20   : > { %970 = vset.pattern.permute.xlu0 (!%p274_p12), %v1045_v9  ;;  %971 = vset.pattern.permute.xlu1 (!%p274_p12), %v1045_v9  ;;  %s282_s29 = scalar_lea.vmem (!%p274_p12), [#allocation2], %s1149_s21  ;;  %v321_v27 = vld [vmem:[%s1315_s1] sm:$0xff] (!%p274_p12)  ;;  %v335_v29 = vld [vmem:[%s1316_s2 + $0x30] sm:$0xff] (!%p274_p12)  ;;  %v322_v30 = vld [vmem:[%s1315_s1 + $0x8] sm:$0xff] (!%p274_p12)  ;;  %vm559_vm1 = vcmask (!%p274_p12), 523264   ;;  %s310_s17 = scalar_lea.vmem (!%p274_p12), [#allocation3], %s1149_s21 }
  0x21   : > { %v314_v11 = vld [vmem:[%s282_s29 + $0x8] sm:$0xff] (!%p274_p12)  ;;  %v316_v12 = vld [vmem:[%s282_s29 + $0x18] sm:$0xff] (!%p274_p12)  ;;  %v313_v13 = vld [vmem:[%s282_s29] sm:$0xff] (!%p274_p12)  ;;  %339 = vperm.xlu0 (!%p274_p12), %970, %v329_v10   ;;  %349 = vperm.xlu1 (!%p274_p12), %971, %v331_v22   ;;  %s796_s21 = sshll.u32 (!%p274_p12), %s310_s17, 4  ;;  %s893_s18 = sshll.u32 (!%p274_p12), %s863_s28, 8  ;;  %s1263_s21 = int_to_ptr.vmem [resolvable:$true] %s796_s21 }
  0x22   : > { %v894_v14 = vpack.c.bf16 (!%p274_p12), %v316_v12, %v314_v11  ;;  %v315_v15 = vld [vmem:[%s282_s29 + $0x10] sm:$0xff] (!%p274_p12)  ;;  %v318_v16 = vld [vmem:[%s282_s29 + $0x28] sm:$0xff] (!%p274_p12)  ;;  %v320_v17 = vld [vmem:[%s282_s29 + $0x38] sm:$0xff] (!%p274_p12)  ;;  %s1268_s23 = scalar_lea.hbm (!%p274_p12), %s1321_s7, %s893_s18  ;;  %s980_s28 = scalar_lea.vmem (!%p274_p12), %s1263_s21, 1024 }
  0x23   : > { %v896_v18 = vpack.c.bf16 (!%p274_p12), %v315_v15, %v313_v13  ;;  %v898_v19 = vpack.c.bf16 (!%p274_p12), %v320_v17, %v318_v16  ;;  %v317_v20 = vld [vmem:[%s282_s29 + $0x20] sm:$0xff] (!%p274_p12)  ;;  %v319_v21 = vld [vmem:[%s282_s29 + $0x30] sm:$0xff] (!%p274_p12)  ;;  %v336_v31 = vld [vmem:[%s1316_s2 + $0x38] sm:$0xff] (!%p274_p12)  ;;  %s1272_s29 = scalar_lea.sflag (!%p274_p12), [#allocation4], %s280_s20  ;;  %p981_p13 = scmp.ne.s32.totalorder (!%p274_p12), %s1263_s21, %s980_s28 }
  0x24   : > { %895 = vmatprep.subr.bf16.mxu0 (!%p274_p12), %v894_v14  ;;  %v900_v24 = vpack.c.bf16 (!%p274_p12), %v319_v21, %v317_v20  ;;  %v535_v32 = vld [vmem:[%s1318_s4] sm:$0xff] (!%p274_p12)  ;;  %v323_v33 = vld [vmem:[%s1315_s1 + $0x10] sm:$0xff] (!%p274_p12)  ;;  %v536_v34 = vld [vmem:[%s1318_s4 + $0x8] sm:$0xff] (!%p274_p12)  ;;  %s1046_s8 = smov (!%p274_p12), [#allocation3]  }
  0x25   : > { %897 = vmatpush1.bf16.msra.mxu0 (!%p274_p12), %v896_v18  ;;  %344 = vperm.xlu0 (!%p274_p12), %970, %v330_v23   ;;  %v537_v35 = vld [vmem:[%s1318_s4 + $0x10] sm:$0xff] (!%p274_p12)  ;;  %v324_v36 = vld [vmem:[%s1315_s1 + $0x18] sm:$0xff] (!%p274_p12)  ;;  %v671_v38 = vld [vmem:[%s1320_s6] sm:$0xff] (!%p274_p12)  ;;  %p982_p0 = pnand (!%p274_p12), %p981_p13, %p1128_p6  ;;  %s984_s9 = sshll.u32 (!%p274_p12), %s1046_s8, 4  ;;  %s985_s9 = int_to_ptr.vmem [resolvable:$false] %s984_s9 }
  0x26   : > { %899 = vmatprep.subr.bf16.mxu0 %v898_v19  ;;  %354 = vperm.xlu1 %971, %v332_v25   ;;  %v538_v37 = vld [vmem:[%s1318_s4 + $0x18] sm:$0xff]  ;;  %v325_v39 = vld [vmem:[%s1315_s1 + $0x20] sm:$0xff]  ;;  %v672_v40 = vld [vmem:[%s1320_s6 + $0x8] sm:$0xff]  ;;  %s986_s13 = scalar_lea.vmem %s985_s9, 2048  ;;  %p987_p2 = scmp.lt.s32.totalorder %s1263_s21, %s985_s9 }
  0x27   : > { %v326_v41 = vld [vmem:[%s1315_s1 + $0x28] sm:$0xff]  ;;  %v327_v42 = vld [vmem:[%s1315_s1 + $0x30] sm:$0xff]  ;;  %v328_v43 = vld [vmem:[%s1315_s1 + $0x38] sm:$0xff]  ;;  %p983_p1 = pneg %p982_p0  ;;  %p988_p3 = scmp.lt.s32.totalorder %s986_s13, %s980_s28 }
  0x29   : > { %901 = vmatpush1.bf16.msra.mxu0 %v900_v24  ;;  %359 = vperm.xlu0 %970, %v333_v26   ;;  %p989_p4 = por %p988_p3, %p987_p2 }
  0x2a   : > { %364 = vperm.xlu1 %971, %v334_v28  }
  0x2b   : > { %p990_p5 = pnand %p989_p4, %p983_p1 }
  0x2c   : > { %873 = vmatmul.mubr.msk.f32.vlgmr.msra.gmra.mrb[0].mxu0 %vm377_vm0, %v321_v27 }
  0x2d   : > { %472 = vmatprep.mubr.f32.mxu0 %v1044_v8  ;;  %369 = vperm.xlu0 %970, %v335_v29  }
  0x2e   : > { %374 = vperm.xlu1 %971, %v336_v31  }
  0x30   : > { %874 = vmatmul.mubr.msk.f32.gmra.mrb[2].mxu0 %vm377_vm0, %v322_v30 }
  0x31   : > { %478 = vmatprep.mubr.f32.mxu0 %v1044_v8  ;;  %541 = vperm.xlu0 %970, %v535_v32  }
  0x32   : > { %546 = vperm.xlu1 %971, %v536_v34  }
  0x34   : > { %875 = vmatmul.mubr.msk.f32.gmra.mrb[4].mxu0 %vm377_vm0, %v323_v33 }
  0x35   : > { %484 = vmatprep.mubr.f32.mxu0 %v1044_v8  ;;  %551 = vperm.xlu0 %970, %v537_v35  }
  0x36   : > { %556 = vperm.xlu1 %971, %v538_v37  }
  0x38   : > { %876 = vmatmul.mubr.msk.f32.gmra.mrb[6].mxu0 %vm377_vm0, %v324_v36 }
  0x39   : > { %490 = vmatprep.mubr.f32.mxu0 %v1044_v8  ;;  %675 = vperm.xlu0 %970, %v671_v38  }
  0x3a   : > { %680 = vperm.xlu1 %971, %v672_v40  }
  0x3c   : > { %877 = vmatmul.mubr.msk.f32.gmra.mrb[8].mxu0 %vm377_vm0, %v325_v39 }
  0x3d   : > { %496 = vmatprep.mubr.f32.mxu0 %v1044_v8 }
  0x40   : > { %878 = vmatmul.mubr.msk.f32.gmra.mrb[10].mxu0 %vm377_vm0, %v326_v41 }
  0x41   : > { %502 = vmatprep.mubr.f32.mxu0 %v1044_v8 }
  0x44   : > { %879 = vmatmul.mubr.msk.f32.gmra.mrb[12].mxu0 %vm377_vm0, %v327_v42 }
  0x45   : > { %508 = vmatprep.mubr.f32.mxu0 %v1044_v8 }
  0x48   : > { %880 = vmatmul.mubr.msk.f32.gmra.mrb[14].mxu0 %vm377_vm0, %v328_v43 }
  0xa0   : > { %v340_v44 = vpop.permute.xlu0 %339  ;;  %v350_v53 = vpop.permute.xlu1 %349 }
  0xa4   : > { %v345_v48 = vpop.permute.xlu0 %344 }
  0xa5   : > { %v355_v0 = vpop.permute.xlu1 %354 }
  0xa8   : > { %v360_v14 = vpop.permute.xlu0 %359 }
  0xa9   : > { %v365_v17 = vpop.permute.xlu1 %364 }
  0xac   : > { %v370_v30 = vpop.permute.xlu0 %369 }
  0xad   : > { %v375_v33 = vpop.permute.xlu1 %374 }
  0xff   : > { %v468_v45 = vpop.f32.mrb[0].mxu0 }
 0x100   : > { %v470_v46 = vpop.f32.mrb[1].mxu0  ;;  %v469_v47 = vadd.f32 %v468_v45, %v340_v44  ;;  %v531_v45 = vld [vmem:[%s1317_s3] sm:$0xff] }
 0x101   : > { %v471_v49 = vadd.f32 %v470_v46, %v340_v44  ;;  %v532_v46 = vld [vmem:[%s1317_s3 + $0x8] sm:$0xff] }
 0x102   : > { %v515_v55 = vmax.f32 %v469_v47, 0.0  ;;  %v533_v47 = vld [vmem:[%s1317_s3 + $0x10] sm:$0xff] }
 0x103   : > { %v474_v50 = vpop.f32.mrb[2].mxu0  ;;  %v516_v57 = vmax.f32 %v471_v49, 0.0 }
 0x104   : > { %v475_v51 = vadd.f32 %v474_v50, %v345_v48  ;;  %v476_v52 = vpop.f32.mrb[3].mxu0 }
 0x105   : > { %v477_v54 = vadd.f32 %v476_v52, %v345_v48  ;;  %v534_v48 = vld [vmem:[%s1317_s3 + $0x18] sm:$0xff] }
 0x106   : > { %v517_v56 = vmax.f32 %v475_v51, 0.0  ;;  %v542_v51 = vpop.permute.xlu0 %541 }
 0x107   : > { %v518_v58 = vmax.f32 %v477_v54, 0.0  ;;  %v480_v59 = vpop.f32.mrb[4].mxu0 }
 0x108   : > { %v482_v60 = vpop.f32.mrb[5].mxu0  ;;  %v904_v61 = vpack.c.bf16 %v517_v56, %v515_v55  ;;  %v481_v63 = vadd.f32 %v480_v59, %v350_v53 }
 0x109   : > { %v902_v62 = vpack.c.bf16 %v518_v58, %v516_v57  ;;  %v483_v1 = vadd.f32 %v482_v60, %v350_v53  ;;  %v547_v53 = vpop.permute.xlu1 %546 }
 0x10a   : > { %v519_v6 = vmax.f32 %v481_v63, 0.0 }
 0x10b   : > { %v486_v2 = vpop.f32.mrb[6].mxu0  ;;  %903 = vmatprep.subr.bf16.mxu1 %v902_v62  ;;  %v520_v9 = vmax.f32 %v483_v1, 0.0 }
 0x10c   : > { %v487_v3 = vadd.f32 %v486_v2, %v355_v0  ;;  %v488_v4 = vpop.f32.mrb[7].mxu0  ;;  %905 = vmatpush1.bf16.msra.mxu1 %v904_v61  ;;  %v552_v2 = vpop.permute.xlu0 %551 }
 0x10d   : > { %v489_v5 = vadd.f32 %v488_v4, %v355_v0 }
 0x10e   : > { %v521_v7 = vmax.f32 %v487_v3, 0.0 }
 0x10f   : > { %v522_v10 = vmax.f32 %v489_v5, 0.0  ;;  %v492_v11 = vpop.f32.mrb[8].mxu0  ;;  %v557_v5 = vpop.permute.xlu1 %556 }
 0x110   : > { %v908_v12 = vpack.c.bf16 %v521_v7, %v519_v6  ;;  %v494_v13 = vpop.f32.mrb[9].mxu0  ;;  %v493_v16 = vadd.f32 %v492_v11, %v360_v14 }
 0x111   : > { %v906_v15 = vpack.c.bf16 %v522_v10, %v520_v9  ;;  %v495_v18 = vadd.f32 %v494_v13, %v360_v14 }
 0x112   : > { %v523_v23 = vmax.f32 %v493_v16, 0.0 }
 0x113   : > { %v498_v19 = vpop.f32.mrb[10].mxu0  ;;  %907 = vmatprep.subr.bf16.mxu1 %v906_v15  ;;  %v524_v25 = vmax.f32 %v495_v18, 0.0  ;;  %v669_v18 = vld [vmem:[%s1319_s5] sm:$0xff] }
 0x114   : > { %v499_v20 = vadd.f32 %v498_v19, %v365_v17  ;;  %v500_v21 = vpop.f32.mrb[11].mxu0  ;;  %909 = vmatpush1.bf16.msra.mxu1 %v908_v12  ;;  %v670_v19 = vld [vmem:[%s1319_s5 + $0x8] sm:$0xff] }
 0x115   : > { %v501_v22 = vadd.f32 %v500_v21, %v365_v17 }
 0x116   : > { %v525_v24 = vmax.f32 %v499_v20, 0.0  ;;  %v676_v20 = vpop.permute.xlu0 %675 }
 0x117   : > { %v526_v26 = vmax.f32 %v501_v22, 0.0  ;;  %v504_v27 = vpop.f32.mrb[12].mxu0 }
 0x118   : > { %v912_v28 = vpack.c.bf16 %v525_v24, %v523_v23  ;;  %v506_v29 = vpop.f32.mrb[13].mxu0  ;;  %v505_v32 = vadd.f32 %v504_v27, %v370_v30 }
 0x119   : > { %v910_v31 = vpack.c.bf16 %v526_v26, %v524_v25  ;;  %v507_v34 = vadd.f32 %v506_v29, %v370_v30  ;;  %v681_v26 = vpop.permute.xlu1 %680 }
 0x11a   : > { %v527_v39 = vmax.f32 %v505_v32, 0.0 }
 0x11b   : > { %v510_v35 = vpop.f32.mrb[14].mxu0  ;;  %911 = vmatprep.subr.bf16.mxu1 %v910_v31  ;;  %v528_v41 = vmax.f32 %v507_v34, 0.0 }
 0x11c   : > { %v511_v36 = vadd.f32 %v510_v35, %v375_v33  ;;  %v512_v37 = vpop.f32.mrb[15].mxu0  ;;  %913 = vmatpush1.bf16.msra.mxu1 %v912_v28 }
 0x11d   : > { %v513_v38 = vadd.f32 %v512_v37, %v375_v33 }
 0x11e   : > { %v529_v40 = vmax.f32 %v511_v36, 0.0 }
 0x11f   : > { %v530_v42 = vmax.f32 %v513_v38, 0.0 }
 0x120   : > { %v916_v43 = vpack.c.bf16 %v529_v40, %v527_v39 }
 0x121   : > { %v914_v44 = vpack.c.bf16 %v530_v42, %v528_v41 }
 0x123   : > { %915 = vmatprep.subr.bf16.mxu1 %v914_v44 }
 0x124   : > { %917 = vmatpush1.bf16.msra.mxu1 %v916_v43 }
 0x127   : > { %881 = vmatmul.mubr.msk.f32.vlgmr.msra.gmra.mrb[0].mxu1 %vm559_vm1, %v531_v45 }
 0x128   : > { %642 = vmatprep.mubr.f32.mxu1 %v1044_v8 }
 0x12b   : > { %882 = vmatmul.mubr.msk.f32.gmra.mrb[2].mxu1 %vm559_vm1, %v532_v46 }
 0x12c   : > { %648 = vmatprep.mubr.f32.mxu1 %v1044_v8 }
 0x12f   : > { %883 = vmatmul.mubr.msk.f32.gmra.mrb[4].mxu1 %vm559_vm1, %v533_v47 }
 0x130   : > { %654 = vmatprep.mubr.f32.mxu1 %v1044_v8 }
 0x133   : > { %884 = vmatmul.mubr.msk.f32.gmra.mrb[6].mxu1 %vm559_vm1, %v534_v48 }
 0x134   : > { %753 = vmatprep.mubr.f32.mxu1 %v1044_v8 }
 0x1fa   : > { %v638_v49 = vpop.f32.mrb[0].mxu1 }
 0x1fb   : > { %v640_v50 = vpop.f32.mrb[1].mxu1  ;;  %v639_v52 = vadd.f32 %v638_v49, %v542_v51 }
 0x1fc   : > { %v641_v54 = vadd.f32 %v640_v50, %v542_v51 }
 0x1fd   : > { %v661_v59 = vmax.f32 %v639_v52, 0.0 }
 0x1fe   : > { %v644_v55 = vpop.f32.mrb[2].mxu1  ;;  %v662_v61 = vmax.f32 %v641_v54, 0.0 }
 0x1ff   : > { %v645_v56 = vadd.f32 %v644_v55, %v547_v53  ;;  %v646_v57 = vpop.f32.mrb[3].mxu1 }
 0x200   : > { %v647_v58 = vadd.f32 %v646_v57, %v547_v53 }
 0x201   : > { %v663_v60 = vmax.f32 %v645_v56, 0.0 }
 0x202   : > { %v664_v62 = vmax.f32 %v647_v58, 0.0  ;;  %v650_v63 = vpop.f32.mrb[4].mxu1 }
 0x203   : > { %v920_v0 = vpack.c.bf16 %v663_v60, %v661_v59  ;;  %v652_v1 = vpop.f32.mrb[5].mxu1  ;;  %v651_v4 = vadd.f32 %v650_v63, %v552_v2 }
 0x204   : > { %v918_v3 = vpack.c.bf16 %v664_v62, %v662_v61  ;;  %v653_v6 = vadd.f32 %v652_v1, %v552_v2 }
 0x205   : > { %v665_v12 = vmax.f32 %v651_v4, 0.0 }
 0x206   : > { %v656_v7 = vpop.f32.mrb[6].mxu1  ;;  %919 = vmatprep.subr.bf16.mxu1 %v918_v3  ;;  %v666_v14 = vmax.f32 %v653_v6, 0.0 }
 0x207   : > { %v657_v9 = vadd.f32 %v656_v7, %v557_v5  ;;  %v658_v10 = vpop.f32.mrb[7].mxu1  ;;  %921 = vmatpush1.bf16.msra.mxu1 %v920_v0 }
 0x208   : > { %v659_v11 = vadd.f32 %v658_v10, %v557_v5 }
 0x209   : > { %v667_v13 = vmax.f32 %v657_v9, 0.0 }
 0x20a   : > { %v668_v15 = vmax.f32 %v659_v11, 0.0 }
 0x20b   : > { %v924_v16 = vpack.c.bf16 %v667_v13, %v665_v12 }
 0x20c   : > { %v922_v17 = vpack.c.bf16 %v668_v15, %v666_v14 }
 0x20e   : > { %923 = vmatprep.subr.bf16.mxu1 %v922_v17 }
 0x20f   : > { %925 = vmatpush1.bf16.msra.mxu1 %v924_v16 }
 0x212   : > { %885 = vmatmul.mubr.msk.f32.vlgmr.msra.gmra.mrb[8].mxu1 %vm377_vm0, %v669_v18 }
 0x213   : > { %759 = vmatprep.mubr.f32.mxu1 %v1044_v8 }
 0x216   : > { %886 = vmatmul.mubr.msk.f32.gmra.mrb[10].mxu1 %vm377_vm0, %v670_v19 }
 0x2e5   : > { %v755_v21 = vpop.f32.mrb[8].mxu1 }
 0x2e6   : > { %v756_v22 = vadd.f32 %v755_v21, %v676_v20  ;;  %v757_v23 = vpop.f32.mrb[9].mxu1 }
 0x2e7   : > { %v758_v24 = vadd.f32 %v757_v23, %v676_v20 }
 0x2e8   : > { %v766_v25 = vmul.f32 1.442695, %v756_v22  ;;  %774 = vst [vmem:[%s310_s17] sm:$0xff] %v756_v22 }
 0x2e9   : > { %v768_v27 = vmul.f32 1.442695, %v758_v24  ;;  %775 = vst [vmem:[%s310_s17 + $0x8] sm:$0xff] %v758_v24  ;;  %v761_v28 = vpop.f32.mrb[10].mxu1 }
 0x2ea   : > { %972 = vpow2.f32 %v766_v25  ;;  %v762_v8 = vadd.f32 %v761_v28, %v681_v26  ;;  %v763_v29 = vpop.f32.mrb[11].mxu1 }
 0x2eb   : > { %974 = vpow2.f32 %v768_v27  ;;  %v764_v30 = vadd.f32 %v763_v29, %v681_v26 }
 0x2ec   : > { %v770_v31 = vmul.f32 1.442695, %v762_v8  ;;  %776 = vst [vmem:[%s310_s17 + $0x10] sm:$0xff] %v762_v8 }
 0x2ed   : > { %v772_v32 = vmul.f32 1.442695, %v764_v30  ;;  %777 = vst [vmem:[%s310_s17 + $0x18] sm:$0xff] %v764_v30 }
 0x2ee   : > { %976 = vpow2.f32 %v770_v31 }
 0x2ef   : > { %978 = vpow2.f32 %v772_v32 }
 0x2f4   : > { %v973_v33 = vpop.eup %972 }
 0x2f5   : > { %v975_v34 = vpop.eup %974  ;;  %778 = vst [vmem:[%s310_s17 + $0x20] sm:$0xff] %v973_v33 }
 0x2f6   : > { %779 = vst [vmem:[%s310_s17 + $0x28] sm:$0xff] %v975_v34 }
 0x2f8   : > { %v977_v35 = vpop.eup %976 }
 0x2f9   : > { %v979_v36 = vpop.eup %978  ;;  %780 = vst [vmem:[%s310_s17 + $0x30] sm:$0xff] %v977_v35 }
 0x2fa   : > { %781 = vst [vmem:[%s310_s17 + $0x38] sm:$0xff] %v979_v36 }
 0x2fb   : > { %993 = shalt.err (!%p990_p5)
}
 0x2fc   : > { %s994_s20 = scalar_lea.hbm %s1268_s23, 1024  ;;  %s998_s16 = scalar_lea.hbm %s1321_s7, 2048 }
 0x2fd   : > { %p995_p7 = scmp.ne.s32.totalorder %s1268_s23, %s994_s20  ;;  %p999_p12 = scmp.lt.u32.totalorder %s1268_s23, %s1321_s7 }
 0x2fe   : > { %p1000_p13 = scmp.lt.u32.totalorder %s998_s16, %s994_s20  ;;  %p1002_p1 = scmp.lt.u32.totalorder %s994_s20, %s1268_s23 }
 0x2ff   : > { %p996_p10 = pnand %p995_p7, %p1128_p6 }
 0x300   : > { %p1001_p0 = por %p1000_p13, %p999_p12 }
 0x301   : > { %p997_p11 = pneg %p996_p10 }
 0x302   : > { %p1003_p2 = por %p1002_p1, %p1001_p0 }
 0x304   : > { %p1004_p3 = pnand %p1003_p2, %p997_p11 }
 0x306   : > { %1007 = shalt.err (!%p1004_p3)
}
 0x307   : > { %s1047_s19 = smov 256   ;;  %s1048_s22 = smov 512  }
 0x308   : > { %s1049_s28 = smov 16  }
 0x309   : > { %926 = dma.vmem_to_hbm [thread:$0]  (%p1128_p6), %s1263_s21, 1024, %s1268_s23, %s1272_s29, %s1047_s19, %s1048_s22, %s1049_s28  }
 0x30a PF: > { %s811_s8 = sand.u32 1, %s1030_s24   ;;  %p929_p4 = pnand %p866_p9, %p1132_p8 }
 0x30b   : > { %s812_s9 = scalar_lea.sflag [#allocation4], %s811_s8 }
 0x30c   : > { %1025 = dma.done.wait (!%p929_p4), %s812_s9, 1024  }
 0x30d   : > { %1027 = vsyncadd (!%p929_p4), %s812_s9, 4294966272  ;;  %p17_p5 = scmp.ge.s32.totalorder %s1113_s30, 4   ;;  %s1324_s24 = smov %s1034_s25 }
 0x30e   : > { %s1325_s25 = smov %s1038_s26  ;;  %s1326_s26 = smov %s1126_s10 }
 0x30f   : > { %s1327_s27 = smov %s1113_s30  ;;  %19 = sbr.rel (!%p17_p5) target bundleno = 3 (0x3), region = 111 }
 0x316   :  { %817 = vsyncpa [#allocation4], 1 }
 0x317   :  { %819 = vsyncpa [#allocation4 + $0x1], 1 }

</bundles_post_ra>
